<compile_context>
chip_gen: v5e
topology: v5e:2x2
jax: 0.10.0
libtpu: 0.0.40
codegen_flags: <defaults>
</compile_context>

<pallas_src>
import functools

import jax
import jax.numpy as jnp
from jax.experimental import pallas as pl
from jax.experimental.pallas import tpu as pltpu


def _round_up(x, m):
    return ((x + m - 1) // m) * m


def _cdiv(a, b):
    return -(-a // b)


def _choose_tiling(d1, tm):
    """Row-tile size (multiple of 8) + grid length.

    Keeps the step count even (and >=2 when d1 is large) so the 1-D "parallel"
    grid axis shards evenly across both TensorCores on v7x; never splits tiny d1.
    """
    d1_r8 = max(8, _round_up(d1, 8))
    tm_eff = min(_round_up(max(tm, 8), 8), d1_r8)
    steps = _cdiv(d1_r8, tm_eff)
    if steps == 1 and d1_r8 >= 2048:
        # One giant tile would leave a v7x TensorCore idle: split in two.
        tm_eff = _round_up(_cdiv(d1_r8, 2), 8)
    elif steps > 1 and steps % 2 == 1:
        # Odd step count -> ceil/floor imbalance across the two cores.
        tm_eff = _round_up(_cdiv(d1_r8, steps + 1), 8)
    steps = _cdiv(d1_r8, tm_eff)
    return tm_eff, steps


def dist_encoder_kernel(q_ref, w_ref, c_ref, o_ref):
    # q_ref: (tm, n_hid)  w_ref: (n_hid, n_cls)  c_ref: (1, n_cls)  o_ref: (tm, n_cls)
    o_ref[...] = (
        jnp.dot(q_ref[...], w_ref[...], preferred_element_type=jnp.float32)
        + c_ref[...]
    ).astype(o_ref.dtype)


def fold_params(weight, proto, bias):
    """One-time algebraic fold of the Linear around the pairwise-diff structure.

    weight: (n_cls, n_cls*n_hid), proto: (n_cls, n_hid), bias: (n_cls,).
    Hoist this out of the hot path (weights / prototypes are static at inference).
    """
    n_cls, n_hid = proto.shape
    w_fold = weight.reshape(n_cls, n_cls, n_hid).sum(axis=1).T.astype(jnp.float32)
    c = (bias - weight @ proto.reshape(-1)).reshape(1, n_cls).astype(jnp.float32)
    return w_fold, c


@functools.partial(jax.jit, static_argnames=("tm",))
def dist_encoder_folded(query, w_fold, c, *, tm=4096):
    """query: (d1, n_hid); w_fold: (n_hid, n_cls); c: (1, n_cls) -> (d1, n_cls)."""
    d1, n_hid = query.shape
    n_cls = w_fold.shape[1]
    tm_eff, steps = _choose_tiling(d1, tm)

    cost = pl.CostEstimate(
        flops=2 * d1 * n_hid * n_cls,
        transcendentals=0,
        bytes_accessed=d1 * (n_hid + n_cls) * 4 + (n_hid + 1) * n_cls * 4,
    )

    return pl.pallas_call(
        dist_encoder_kernel,
        out_shape=jax.ShapeDtypeStruct((d1, n_cls), jnp.float32),
        grid=(steps,),
        in_specs=[
            # query row-tile (pipelined over the grid); last dim = full array dim
            pl.BlockSpec((tm_eff, n_hid), lambda i: (i, 0)),
            # folded weight: tiny, VMEM-resident across all steps
            pl.BlockSpec((n_hid, n_cls), lambda i: (0, 0)),
            # fused bias + proto constant
            pl.BlockSpec((1, n_cls), lambda i: (0, 0)),
        ],
        # unpadded output: block last dim equals the full array dim (legal),
        # ragged last row-tile relies on Pallas discarding OOB writes.
        out_specs=pl.BlockSpec((tm_eff, n_cls), lambda i: (i, 0)),
        compiler_params=pltpu.CompilerParams(
            dimension_semantics=("parallel",)),
        cost_estimate=cost,
    )(query, w_fold, c)


@functools.partial(jax.jit, static_argnames=("tm",))
def dist_encoder(query, proto, weight, bias, *, tm=4096):
    """End-to-end convenience wrapper (fold + kernel under one jit so glue fuses)."""
    w_fold, c = fold_params(weight, proto, bias)
    return dist_encoder_folded(query, w_fold, c, tm=tm)


def dist_encoder_ref(query, proto, weight, bias):
    d1 = query.shape[0]
    d2 = proto.shape[0]
    q_rep = jnp.repeat(query, d2, axis=0)        # torch.repeat_interleave(query, d2, 0)
    p_til = jnp.tile(proto, (d1, 1))             # torch.tile(proto, (d1, 1))
    diff = (q_rep - p_til).reshape(d1, -1)
    return diff @ weight.T + bias


if __name__ == "__main__":
    n_hid = 32
    n_cls = 4

    key = jax.random.PRNGKey(0)
    kq, kp, kw, kb, kq2 = jax.random.split(key, 5)

    proto = jax.random.normal(kp, (n_cls, n_hid), dtype=jnp.float32)

    # nn.Linear(n_hid * n_cls, n_cls): weight (out, in), bias (out,)
    fan_in = n_hid * n_cls
    bound = 1.0 / (fan_in ** 0.5)
    weight = jax.random.uniform(kw, (n_cls, fan_in), minval=-bound, maxval=bound,
                                dtype=jnp.float32)
    bias = jax.random.uniform(kb, (n_cls,), minval=-bound, maxval=bound,
                              dtype=jnp.float32)

    # fold once — the hot path only ever sees (query, w_fold, c)
    w_fold, c = fold_params(weight, proto, bias)
    w_fold, c = jax.block_until_ready((w_fold, c))

    # small shape: single grid step, exact rows
    q_small = jax.random.normal(kq, (8, n_hid), dtype=jnp.float32)
    out = jax.block_until_ready(dist_encoder_folded(q_small, w_fold, c))
    ref = dist_encoder_ref(q_small, proto, weight, bias)
    assert out.shape == (8, n_cls)
    assert jnp.allclose(out, ref, atol=1e-4, rtol=1e-4), "f32 mismatch (small)"

    # ragged d1 (not a multiple of 8): OOB rows in the last tile are discarded, no jnp.pad
    q_big = jax.random.normal(kq2, (300, n_hid), dtype=jnp.float32)
    out_b = jax.block_until_ready(dist_encoder_folded(q_big, w_fold, c))
    ref_b = dist_encoder_ref(q_big, proto, weight, bias)
    assert out_b.shape == (300, n_cls)
    assert jnp.allclose(out_b, ref_b, atol=1e-4, rtol=1e-4), "f32 mismatch (ragged)"

    # small tm forces a multi-step grid; tiling helper rounds the step count to even
    out_t = jax.block_until_ready(dist_encoder_folded(q_big, w_fold, c, tm=128))
    assert jnp.allclose(out_t, ref_b, atol=1e-4, rtol=1e-4), "f32 mismatch (multi-step)"

    # end-to-end wrapper (fold fused under the same jit)
    out_e = jax.block_until_ready(dist_encoder(q_big, proto, weight, bias))
    assert jnp.allclose(out_e, ref_b, atol=1e-4, rtol=1e-4), "f32 mismatch (end-to-end)"

    print("KERNEL_OK")
</pallas_src>

<mosaic_0001>
module attributes {stable_mosaic.version = 11 : i64} {
  func.func @dist_encoder_kernel(%arg0: i32, %arg1: memref<8x32xf32, #tpu.memory_space<vmem>>, %arg2: memref<32x4xf32, #tpu.memory_space<vmem>>, %arg3: memref<1x4xf32, #tpu.memory_space<vmem>>, %arg4: memref<8x4xf32, #tpu.memory_space<vmem>>) attributes {dimension_semantics = [#tpu.dimension_semantics<parallel>], iteration_bounds = array<i64: 1>, scalar_prefetch = 0 : i64, scratch_operands = 0 : i64, tpu.core_type = #tpu.core_type<tc>, window_params = [{transform_indices = @transform_0, window_bounds = array<i64: 8, 32>}, {pipeline_mode = #tpu.pipeline_mode<synchronous>, transform_indices = @transform_1, window_bounds = array<i64: 32, 4>}, {pipeline_mode = #tpu.pipeline_mode<synchronous>, transform_indices = @transform_2, window_bounds = array<i64: 1, 4>}, {transform_indices = @transform_3, window_bounds = array<i64: 8, 4>}]} {
    %c0 = arith.constant 0 : index
    %c0_0 = arith.constant 0 : index
    %0 = vector.load %arg1[%c0, %c0_0] : memref<8x32xf32, #tpu.memory_space<vmem>>, vector<8x32xf32>
    %c0_1 = arith.constant 0 : index
    %c0_2 = arith.constant 0 : index
    %1 = vector.load %arg2[%c0_1, %c0_2] : memref<32x4xf32, #tpu.memory_space<vmem>>, vector<32x4xf32>
    %cst = arith.constant dense<0.000000e+00> : vector<8x4xf32>
    %2 = tpu.matmul %0, %1, %cst {dimension_numbers = #tpu.dot_dimension_numbers<[1], [0], [0], [1], [0, 0, 1, 1], [], []>} : vector<8x32xf32>, vector<32x4xf32>, vector<8x4xf32> -> vector<8x4xf32>
    %c0_3 = arith.constant 0 : index
    %c0_4 = arith.constant 0 : index
    %3 = vector.load %arg3[%c0_3, %c0_4] : memref<1x4xf32, #tpu.memory_space<vmem>>, vector<1x4xf32>
    %4 = vector.broadcast %3 : vector<1x4xf32> to vector<8x4xf32>
    %5 = arith.addf %2, %4 : vector<8x4xf32>
    %c0_5 = arith.constant 0 : index
    %c0_6 = arith.constant 0 : index
    %6 = vector.load %arg4[%c0_5, %c0_6] : memref<8x4xf32, #tpu.memory_space<vmem>>, vector<8x4xf32>
    tpu.vector_store %arg4[%c0_5, %c0_6], %5 {strides = array<i32>} : memref<8x4xf32, #tpu.memory_space<vmem>>, vector<8x4xf32>,
    return
  }
  func.func @transform_0(%arg0: i32) -> (i32, i32) {
    %c0_i32 = arith.constant 0 : i32
    %c0_i32_0 = arith.constant 0 : i32
    return %arg0, %c0_i32 : i32, i32
  }
  func.func @transform_1(%arg0: i32) -> (i32, i32) {
    %c0_i32 = arith.constant 0 : i32
    %c0_i32_0 = arith.constant 0 : i32
    %c0_i32_1 = arith.constant 0 : i32
    return %c0_i32, %c0_i32_0 : i32, i32
  }
  func.func @transform_2(%arg0: i32) -> (i32, i32) {
    %c0_i32 = arith.constant 0 : i32
    %c0_i32_0 = arith.constant 0 : i32
    %c0_i32_1 = arith.constant 0 : i32
    return %c0_i32, %c0_i32_0 : i32, i32
  }
  func.func @transform_3(%arg0: i32) -> (i32, i32) {
    %c0_i32 = arith.constant 0 : i32
    %c0_i32_0 = arith.constant 0 : i32
    return %arg0, %c0_i32 : i32, i32
  }
}

</mosaic_0001>

<bundles_post_ra>
// kernel: dist_encoder_folded.1
= control target key start
LH: loop header
LB: loop body
LE: loop exit
PB: predicated region body
PF: predicated region fallthrough
CT: control target
= control target key end

     0   :  { %vm23_vm0 = vcmask 261120   ;;  %vm47_vm1 = vcmask 31744   ;;  %s96_s1 = inlined_call_operand.vmem [shape: f32[32,4], index: 1, kind: input, shape index: {}]   ;;  %s97_s2 = inlined_call_operand.vmem [shape: f32[1,4], index: 2, kind: input, shape index: {}]   ;;  %s98_s0 = inlined_call_operand.vmem [shape: f32[8,32], index: 0, kind: input, shape index: {}]   ;;  %s99_s3 = inlined_call_operand.vmem [shape: f32[8,4], index: 3, kind: output, shape index: {}]  }
   0x1   :  { %v18_v0 = vld [vmem:[%s96_s1 + $0x18] sm:$0xff]  ;;  %v17_v1 = vld [vmem:[%s96_s1 + $0x10] sm:$0xff]  ;;  %v16_v2 = vld [vmem:[%s96_s1 + $0x8] sm:$0xff] }
   0x2   :  { %39 = vmatpush.msra.mxu0 %v18_v0  ;;  %v15_v3 = vld [vmem:[%s96_s1] sm:$0xff] }
   0x3   :  { %v14_v4 = vld [vmem:[%s98_s0] sm:$0xff] }
   0x4   :  { %40 = vmatpush.msra.mxu0 %v17_v1  ;;  %v54_v5 = vld [vmem:[%s97_s2] ss:$0 sm:$0xff] }
   0x6   :  { %41 = vmatpush.msra.mxu0 %v16_v2 }
   0x8   :  { %42 = vmatpush.msra.mxu0 %v15_v3 }
   0x9   :  { %53 = vmatmul.msk.f32.vlgmr.msra.gmra.mxu0 %vm23_vm0, %v14_v4 }
  0x86   :  { %v44_v6 = vpop.f32.mrf.mxu0 }
  0x87   :  { %v45_v7 = vadd.f32 %v54_v5, %v44_v6 }
  0x89   :  { %48 = vst.msk [vmem:[%s99_s3] sm:$0xff] %vm47_vm1, %v45_v7 }

</bundles_post_ra>
